<compile_context>
chip_gen: v7x
topology: tpu7x:2x2x1
jax: 0.10.0
libtpu: 0.0.40
codegen_flags: <defaults>
</compile_context>

<pallas_src>
import jax
import jax.numpy as jnp
from jax.experimental import pallas as pl
from jax.experimental.pallas import tpu as pltpu


def net1_kernel(x_ref,
                ws_ref, bs_ref,      # inner net: share branch
                w1_ref, b1_ref,      # inner net: main feature
                wh_ref, bh_ref,      # head Linear (lane-padded weights only)
                out_ref, share_ref):
    # --- inner net1: share_feature = ReLU(x @ Ws + bs) --- (f32 MXU acc)
    share_f32 = jnp.dot(x_ref[...], ws_ref[...],
                        preferred_element_type=jnp.float32) + bs_ref[...]
    share_f32 = jnp.maximum(share_f32, 0.0)

    # One bf16 pack, reused for both the next matmul operand and the store
    # (halves the share HBM write stream and saves a VPU pack pass on v5e).
    share_bf16 = share_f32.astype(jnp.bfloat16)
    share_ref[...] = share_bf16.astype(share_ref.dtype)

    # --- inner net1: feat = ReLU(share @ W1 + b1) ---
    feat = jnp.dot(share_bf16, w1_ref[...],
                   preferred_element_type=jnp.float32) + b1_ref[...]
    feat = jnp.maximum(feat, 0.0)

    # --- head Linear: lane-dense (128-wide) MXU matmul, NARROW store ---
    out = jnp.dot(feat.astype(wh_ref.dtype), wh_ref[...],
                  preferred_element_type=jnp.float32) + bh_ref[...]
    n_out = out_ref.shape[-1]
    out_ref[...] = out[:, :n_out].astype(out_ref.dtype)


def _choose_batch_tiling(B, tb_max=1024):
    """Pick (tile_rows, padded_batch): big tiles, sublane-aligned, 2-way split
    (balanced work for v7x's two TensorCores) whenever the batch fits."""
    Bp = ((B + 7) // 8) * 8                  # sublane (8) alignment
    if Bp <= tb_max:
        if Bp >= 16:
            tb = ((Bp + 15) // 16) * 8       # ceil(Bp/2) rounded up to mult of 8
            return tb, 2 * tb
        return Bp, Bp                        # single tiny tile
    tb = tb_max
    return tb, pl.cdiv(Bp, tb) * tb


def net1_forward(x, params, *, tb_max=1024):
    """x: (B, d_in) -> (out: (B, n_out) f32, share_feature: (B, d_share) bf16)."""
    ws, bs = params["ws"], params["bs"]
    w1, b1 = params["w1"], params["b1"]
    wh, bh = params["wh"], params["bh"]

    B, d_in = x.shape
    d_share = ws.shape[1]
    d1 = w1.shape[1]
    n_out = wh.shape[1]

    # Lane-dense head matmul: pad the narrow head weights to 128 columns for
    # the MXU.  Only the weights are padded; the kernel stores just n_out cols.
    n_out_pad = max(128, pl.cdiv(n_out, 128) * 128)
    wh_p = jnp.zeros((d1, n_out_pad), jnp.float32).at[:, :n_out].set(wh)
    bh_p = jnp.zeros((n_out_pad,), jnp.float32).at[:n_out].set(bh)

    tb, Bp = _choose_batch_tiling(B, tb_max)
    num_tiles = Bp // tb
    if Bp != B:
        x = jnp.pad(x, ((0, Bp - B), (0, 0)))

    # bf16 activations/weights; f32 biases added on the f32 accumulator.
    x_bf = x.astype(jnp.bfloat16)
    ws_bf = ws.astype(jnp.bfloat16)
    w1_bf = w1.astype(jnp.bfloat16)
    wh_bf = wh_p.astype(jnp.bfloat16)
    bs_r = bs.reshape(1, d_share).astype(jnp.float32)
    b1_r = b1.reshape(1, d1).astype(jnp.float32)
    bh_r = bh_p.reshape(1, n_out_pad).astype(jnp.float32)

    # Weight-stationary: constant index_map keeps weights/biases VMEM-resident.
    stationary = lambda shape: pl.BlockSpec(shape, lambda i: (0, 0))
    batched = lambda shape: pl.BlockSpec(shape, lambda i: (i, 0))

    # VMEM budget derived from actual tile footprint (double-buffered streams,
    # f32 intermediates), with headroom, kept well under v7x's 64 MiB.
    act_bytes = tb * (d_in * 2 + d_share * 2 + n_out * 4) * 2
    wgt_bytes = ((d_in * d_share + d_share * d1 + d1 * n_out_pad) * 2
                 + (d_share + d1 + n_out_pad) * 4) * 2
    scratch_bytes = tb * max(d_share, d1, n_out_pad) * 4 * 4
    vmem_limit = int(min(max(2 * (act_bytes + wgt_bytes + scratch_bytes),
                             16 * 1024 * 1024), 48 * 1024 * 1024))

    flops = 2 * Bp * (d_in * d_share + d_share * d1 + d1 * n_out_pad)
    bytes_accessed = (
        Bp * d_in * 2
        + (d_in * d_share + d_share * d1 + d1 * n_out_pad) * 2
        + (d_share + d1 + n_out_pad) * 4
        + Bp * (d_share * 2 + n_out * 4))

    out, share = pl.pallas_call(
        net1_kernel,
        out_shape=(
            jax.ShapeDtypeStruct((Bp, n_out), jnp.float32),
            jax.ShapeDtypeStruct((Bp, d_share), jnp.bfloat16),
        ),
        grid=(num_tiles,),
        in_specs=[
            batched((tb, d_in)),
            stationary((d_in, d_share)), stationary((1, d_share)),
            stationary((d_share, d1)), stationary((1, d1)),
            stationary((d1, n_out_pad)), stationary((1, n_out_pad)),
        ],
        out_specs=(
            batched((tb, n_out)),
            batched((tb, d_share)),
        ),
        compiler_params=pltpu.CompilerParams(
            dimension_semantics=("parallel",),
            vmem_limit_bytes=vmem_limit,
        ),
        cost_estimate=pl.CostEstimate(
            flops=flops, transcendentals=0, bytes_accessed=bytes_accessed),
    )(x_bf, ws_bf, bs_r, w1_bf, b1_r, wh_bf, bh_r)

    if Bp != B:
        out = out[:B]
        share = share[:B]
    return out, share


def init_params(key, d_in, d_share, d1, n_out):
    ks = jax.random.split(key, 6)
    scale = 0.05
    # Weights stored as (in_features, out_features) == PyTorch W.T
    return {
        "ws": scale * jax.random.normal(ks[0], (d_in, d_share), jnp.float32),
        "bs": scale * jax.random.normal(ks[1], (d_share,), jnp.float32),
        "w1": scale * jax.random.normal(ks[2], (d_share, d1), jnp.float32),
        "b1": scale * jax.random.normal(ks[3], (d1,), jnp.float32),
        "wh": scale * jax.random.normal(ks[4], (d1, n_out), jnp.float32),
        "bh": scale * jax.random.normal(ks[5], (n_out,), jnp.float32),
    }


def reference_forward(x, p):
    """Pure-JAX reference replicating the kernel's bf16-in / f32-acc casts."""
    f32 = lambda a: a.astype(jnp.bfloat16).astype(jnp.float32)
    xb = f32(x)
    share = jnp.maximum(xb @ f32(p["ws"]) + p["bs"], 0.0)
    share_bf = share.astype(jnp.bfloat16)          # kernel stores/feeds bf16
    feat = jnp.maximum(f32(share_bf) @ f32(p["w1"]) + p["b1"], 0.0)
    out = f32(feat) @ f32(p["wh"]) + p["bh"]
    return out, share_bf


if __name__ == "__main__":
    # Lane-aligned feature dims (128) and a batch (192) that exercises the
    # balanced two-tile batch grid with zero padding.
    B, d_in, d_share, d1, n_out = 192, 128, 128, 128, 2

    key = jax.random.PRNGKey(0)
    kx, kp = jax.random.split(key, 2)
    x = jax.random.normal(kx, (B, d_in), jnp.float32)
    params = init_params(kp, d_in, d_share, d1, n_out)

    out, share = net1_forward(x, params)
    out = jax.block_until_ready(out)
    share = jax.block_until_ready(share)

    ref_out, ref_share = reference_forward(x, params)
    assert out.shape == (B, n_out)
    assert share.shape == (B, d_share)
    assert jnp.allclose(out, ref_out, atol=2e-3, rtol=2e-3)
    assert jnp.allclose(share.astype(jnp.float32),
                        ref_share.astype(jnp.float32), atol=1e-2, rtol=1e-2)

    print("KERNEL_OK")
</pallas_src>

<mosaic_0001>
module attributes {stable_mosaic.version = 11 : i64} {
  func.func @net1_kernel(%arg0: i32, %arg1: memref<96x128xbf16, #tpu.memory_space<vmem>>, %arg2: memref<128x128xbf16, #tpu.memory_space<vmem>>, %arg3: memref<1x128xf32, #tpu.memory_space<vmem>>, %arg4: memref<128x128xbf16, #tpu.memory_space<vmem>>, %arg5: memref<1x128xf32, #tpu.memory_space<vmem>>, %arg6: memref<128x128xbf16, #tpu.memory_space<vmem>>, %arg7: memref<1x128xf32, #tpu.memory_space<vmem>>, %arg8: memref<96x2xf32, #tpu.memory_space<vmem>>, %arg9: memref<96x128xbf16, #tpu.memory_space<vmem>>) attributes {dimension_semantics = [#tpu.dimension_semantics<parallel>], iteration_bounds = array<i64: 2>, scalar_prefetch = 0 : i64, scratch_operands = 0 : i64, tpu.core_type = #tpu.core_type<tc>, window_params = [{transform_indices = @transform_0, window_bounds = array<i64: 96, 128>}, {pipeline_mode = #tpu.pipeline_mode<synchronous>, transform_indices = @transform_1, window_bounds = array<i64: 128, 128>}, {pipeline_mode = #tpu.pipeline_mode<synchronous>, transform_indices = @transform_2, window_bounds = array<i64: 1, 128>}, {pipeline_mode = #tpu.pipeline_mode<synchronous>, transform_indices = @transform_3, window_bounds = array<i64: 128, 128>}, {pipeline_mode = #tpu.pipeline_mode<synchronous>, transform_indices = @transform_4, window_bounds = array<i64: 1, 128>}, {pipeline_mode = #tpu.pipeline_mode<synchronous>, transform_indices = @transform_5, window_bounds = array<i64: 128, 128>}, {pipeline_mode = #tpu.pipeline_mode<synchronous>, transform_indices = @transform_6, window_bounds = array<i64: 1, 128>}, {transform_indices = @transform_7, window_bounds = array<i64: 96, 2>}, {transform_indices = @transform_8, window_bounds = array<i64: 96, 128>}]} {
    %c0 = arith.constant 0 : index
    %c0_0 = arith.constant 0 : index
    %0 = vector.load %arg1[%c0, %c0_0] : memref<96x128xbf16, #tpu.memory_space<vmem>>, vector<96x128xbf16>
    %c0_1 = arith.constant 0 : index
    %c0_2 = arith.constant 0 : index
    %1 = vector.load %arg2[%c0_1, %c0_2] : memref<128x128xbf16, #tpu.memory_space<vmem>>, vector<128x128xbf16>
    %cst = arith.constant dense<0.000000e+00> : vector<96x128xf32>
    %2 = tpu.matmul %0, %1, %cst {dimension_numbers = #tpu.dot_dimension_numbers<[1], [0], [0], [1], [0, 0, 1, 1], [], []>} : vector<96x128xbf16>, vector<128x128xbf16>, vector<96x128xf32> -> vector<96x128xf32>
    %c0_3 = arith.constant 0 : index
    %c0_4 = arith.constant 0 : index
    %3 = vector.load %arg3[%c0_3, %c0_4] : memref<1x128xf32, #tpu.memory_space<vmem>>, vector<1x128xf32>
    %4 = vector.broadcast %3 : vector<1x128xf32> to vector<96x128xf32>
    %5 = arith.addf %2, %4 : vector<96x128xf32>
    %cst_5 = arith.constant 0.000000e+00 : f32
    %6 = vector.broadcast %cst_5 : f32 to vector<96x128xf32>
    %7 = arith.maximumf %5, %6 : vector<96x128xf32>
    %8 = arith.truncf %7 : vector<96x128xf32> to vector<96x128xbf16>
    %c0_6 = arith.constant 0 : index
    %c0_7 = arith.constant 0 : index
    %9 = vector.load %arg9[%c0_6, %c0_7] : memref<96x128xbf16, #tpu.memory_space<vmem>>, vector<96x128xbf16>
    tpu.vector_store %arg9[%c0_6, %c0_7], %8 {strides = array<i32>} : memref<96x128xbf16, #tpu.memory_space<vmem>>, vector<96x128xbf16>,
    %c0_8 = arith.constant 0 : index
    %c0_9 = arith.constant 0 : index
    %10 = vector.load %arg4[%c0_8, %c0_9] : memref<128x128xbf16, #tpu.memory_space<vmem>>, vector<128x128xbf16>
    %cst_10 = arith.constant dense<0.000000e+00> : vector<96x128xf32>
    %11 = tpu.matmul %8, %10, %cst_10 {dimension_numbers = #tpu.dot_dimension_numbers<[1], [0], [0], [1], [0, 0, 1, 1], [], []>} : vector<96x128xbf16>, vector<128x128xbf16>, vector<96x128xf32> -> vector<96x128xf32>
    %c0_11 = arith.constant 0 : index
    %c0_12 = arith.constant 0 : index
    %12 = vector.load %arg5[%c0_11, %c0_12] : memref<1x128xf32, #tpu.memory_space<vmem>>, vector<1x128xf32>
    %13 = vector.broadcast %12 : vector<1x128xf32> to vector<96x128xf32>
    %14 = arith.addf %11, %13 : vector<96x128xf32>
    %cst_13 = arith.constant 0.000000e+00 : f32
    %15 = vector.broadcast %cst_13 : f32 to vector<96x128xf32>
    %16 = arith.maximumf %14, %15 : vector<96x128xf32>
    %17 = arith.truncf %16 : vector<96x128xf32> to vector<96x128xbf16>
    %c0_14 = arith.constant 0 : index
    %c0_15 = arith.constant 0 : index
    %18 = vector.load %arg6[%c0_14, %c0_15] : memref<128x128xbf16, #tpu.memory_space<vmem>>, vector<128x128xbf16>
    %cst_16 = arith.constant dense<0.000000e+00> : vector<96x128xf32>
    %19 = tpu.matmul %17, %18, %cst_16 {dimension_numbers = #tpu.dot_dimension_numbers<[1], [0], [0], [1], [0, 0, 1, 1], [], []>} : vector<96x128xbf16>, vector<128x128xbf16>, vector<96x128xf32> -> vector<96x128xf32>
    %c0_17 = arith.constant 0 : index
    %c0_18 = arith.constant 0 : index
    %20 = vector.load %arg7[%c0_17, %c0_18] : memref<1x128xf32, #tpu.memory_space<vmem>>, vector<1x128xf32>
    %21 = vector.broadcast %20 : vector<1x128xf32> to vector<96x128xf32>
    %22 = arith.addf %19, %21 : vector<96x128xf32>
    %23 = vector.extract_strided_slice %22 {offsets = [0, 0], sizes = [96, 2], strides = [1, 1]} : vector<96x128xf32> to vector<96x2xf32>
    %c0_19 = arith.constant 0 : index
    %c0_20 = arith.constant 0 : index
    %24 = vector.load %arg8[%c0_19, %c0_20] : memref<96x2xf32, #tpu.memory_space<vmem>>, vector<96x2xf32>
    tpu.vector_store %arg8[%c0_19, %c0_20], %23 {strides = array<i32>} : memref<96x2xf32, #tpu.memory_space<vmem>>, vector<96x2xf32>,
    return
  }
  func.func @transform_0(%arg0: i32) -> (i32, i32) {
    %c0_i32 = arith.constant 0 : i32
    %c0_i32_0 = arith.constant 0 : i32
    return %arg0, %c0_i32 : i32, i32
  }
  func.func @transform_1(%arg0: i32) -> (i32, i32) {
    %c0_i32 = arith.constant 0 : i32
    %c0_i32_0 = arith.constant 0 : i32
    %c0_i32_1 = arith.constant 0 : i32
    return %c0_i32, %c0_i32_0 : i32, i32
  }
  func.func @transform_2(%arg0: i32) -> (i32, i32) {
    %c0_i32 = arith.constant 0 : i32
    %c0_i32_0 = arith.constant 0 : i32
    %c0_i32_1 = arith.constant 0 : i32
    return %c0_i32, %c0_i32_0 : i32, i32
  }
  func.func @transform_3(%arg0: i32) -> (i32, i32) {
    %c0_i32 = arith.constant 0 : i32
    %c0_i32_0 = arith.constant 0 : i32
    %c0_i32_1 = arith.constant 0 : i32
    return %c0_i32, %c0_i32_0 : i32, i32
  }
  func.func @transform_4(%arg0: i32) -> (i32, i32) {
    %c0_i32 = arith.constant 0 : i32
    %c0_i32_0 = arith.constant 0 : i32
    %c0_i32_1 = arith.constant 0 : i32
    return %c0_i32, %c0_i32_0 : i32, i32
  }
  func.func @transform_5(%arg0: i32) -> (i32, i32) {
    %c0_i32 = arith.constant 0 : i32
    %c0_i32_0 = arith.constant 0 : i32
    %c0_i32_1 = arith.constant 0 : i32
    return %c0_i32, %c0_i32_0 : i32, i32
  }
  func.func @transform_6(%arg0: i32) -> (i32, i32) {
    %c0_i32 = arith.constant 0 : i32
    %c0_i32_0 = arith.constant 0 : i32
    %c0_i32_1 = arith.constant 0 : i32
    return %c0_i32, %c0_i32_0 : i32, i32
  }
  func.func @transform_7(%arg0: i32) -> (i32, i32) {
    %c0_i32 = arith.constant 0 : i32
    %c0_i32_0 = arith.constant 0 : i32
    return %arg0, %c0_i32 : i32, i32
  }
  func.func @transform_8(%arg0: i32) -> (i32, i32) {
    %c0_i32 = arith.constant 0 : i32
    %c0_i32_0 = arith.constant 0 : i32
    return %arg0, %c0_i32 : i32, i32
  }
}

</mosaic_0001>

<bundles_post_ra>
// kernel: tpu_custom_call.1
= control target key start
LH: loop header
LB: loop body
LE: loop exit
PB: predicated region body
PF: predicated region fallthrough
CT: control target
= control target key end

     0   :  { %14 = vsyncpa [#allocation3], 0  ;;  %s2105_s0 = inlined_call_operand.hbm [shape: bf16[192,128], index: 0, kind: input, shape index: {}]   ;;  %s2106_s1 = inlined_call_operand.hbm [shape: bf16[128,128], index: 1, kind: input, shape index: {}]   ;;  %s2107_s2 = inlined_call_operand.vmem [shape: f32[1,128], index: 2, kind: input, shape index: {}]   ;;  %s2108_s3 = inlined_call_operand.hbm [shape: bf16[128,128], index: 3, kind: input, shape index: {}]   ;;  %s2109_s4 = inlined_call_operand.vmem [shape: f32[1,128], index: 4, kind: input, shape index: {}]   ;;  %s2110_s5 = inlined_call_operand.hbm [shape: bf16[128,128], index: 5, kind: input, shape index: {}]   ;;  %s2111_s6 = inlined_call_operand.vmem [shape: f32[1,128], index: 6, kind: input, shape index: {}]   ;;  %s2112_s7 = inlined_call_operand.vmem [shape: f32[192,2], index: 7, kind: output, shape index: {0}]   ;;  %s2113_s8 = inlined_call_operand.hbm [shape: bf16[192,128], index: 8, kind: output, shape index: {1}]  }
   0x1   :  { %16 = vsyncpa [#allocation3 + $0x1], 0 }
   0x2   :  { %17 = vsyncpa [#allocation6], 0 }
   0x3   :  { %18 = vsyncpa [#allocation9], 0 }
   0x4   :  { %19 = vsyncpa [#allocation4], 0 }
   0x5   :  { %21 = vsyncpa [#allocation4 + $0x1], 0  ;;  %s1750_s27 = smov 0   ;;  %s1752_s28 = smov 0  }
   0x6   :  { %s1754_s29 = smov 0   ;;  %s1756_s30 = smov 0  }
   0x7 LB: > { %2121 = sst [smem:[#allocation15_spill]] %s1682_s27  ;;  %s1771_s9 = sadd.s32 4294967295, %s1694_s30   ;;  %s1694_s30 = sphi %s1756_s30, %s2146_s30   ;;  %s1690_s29 = sphi %s1754_s29, %s2145_s29   ;;  %s1686_s28 = sphi %s1752_s28, %s2144_s28   ;;  %s1682_s27 = sphi %s1750_s27, %s2143_s27  }
   0x8   : > { %s1142_s10 = sadd.s32 4294967294, %s1694_s30   ;;  %p47_p0 = scmp.ne.s32.totalorder %s1686_s28, %s1682_s27 }
   0x9   : > { %p2114_p1 = scmp.eq.s32.totalorder %s1771_s9, 0  ;;  %p229_p3 = scmp.eq.s32.totalorder %s1142_s10, 1 }
   0xa   : > { %p1143_p5 = scmp.ge.s32.totalorder %s1694_s30, 1  ;;  %p236_p7 = scmp.lt.s32.totalorder %s1694_s30, 3 }
   0xb   : > { %p1780_p4 = por %p2114_p1, %p47_p0  ;;  %p1785_p6 = por %p229_p3, %p47_p0 }
   0xc   : > { %p1790_p8 = pnand %p1143_p5, %p236_p7  ;;  %s1696_s14 = smov [#allocation5]  }
   0xd   : > { %s2122_s11 = scalar_select %p1780_p4, 1, 0 }
   0xe   : > { %s2123_s12 = scalar_select %p1785_p6, 1, 0 }
   0xf   : > { %s2125_s13 = scalar_select %p1790_p8, 1, 0 }
  0x10   : > { %2124 = sst [smem:[#allocation16_spill]] %s2123_s12  ;;  %s248_s15 = sshll.u32 %s1696_s14, 4  ;;  %s1794_s15 = int_to_ptr.vmem [resolvable:$true] %s248_s15 }
  0x11   : > { %p1411_p9 = pneg %p1790_p8  ;;  %s1697_s17 = smov [#allocation7]  }
  0x12   : > { %s264_s18 = sshll.u32 %s1697_s17, 4  ;;  %s1698_s19 = smov [#allocation8]   ;;  %s1805_s18 = int_to_ptr.vmem [resolvable:$true] %s264_s18 }
  0x13   : > { %p1801_p11 = pnand %p1411_p9, %p2114_p1  ;;  %s1807_s20 = sshll.u32 %s1698_s19, 4  ;;  %s281_s20 = int_to_ptr.vmem [resolvable:$true] %s1807_s20 }
  0x14   : > { %s1506_s23 = scalar_lea.hbm %s2106_s1, 1024 }
  0x15   : > { %p1507_p12 = scmp.ne.s32.totalorder %s2106_s1, %s1506_s23  ;;  %p1817_p13 = pneg %p1801_p11 }
  0x16   : > { %p1513_p5 = scmp.lt.u32.totalorder %s1506_s23, %s2106_s1 }
  0x17   : > { %p1509_p0 = pnand %p1817_p13, %p1507_p12 }
  0x19   : > { %p1510_p3 = pneg %p1509_p0 }
  0x1b   : > { %p1515_p7 = pnand %p1513_p5, %p1510_p3 }
  0x1d   : > { %1518 = shalt.err (!%p1515_p7)
}
  0x1e   : > { %s1519_s17 = scalar_lea.vmem %s1794_s15, 1024  ;;  %p1527_p2 = scmp.lt.s32.totalorder %s1794_s15, %s1794_s15 }
  0x1f   : > { %p1520_p9 = scmp.ne.s32.totalorder %s1794_s15, %s1519_s17  ;;  %p1528_p6 = scmp.lt.s32.totalorder %s1519_s17, %s1519_s17 }
  0x21   : > { %p1522_p10 = pnand %p1520_p9, %p1817_p13  ;;  %p1529_p12 = por %p1528_p6, %p1527_p2 }
  0x23   : > { %p1523_p1 = pneg %p1522_p10 }
  0x25   : > { %p1530_p0 = pnand %p1529_p12, %p1523_p1 }
  0x27   : > { %1533 = shalt.err (!%p1530_p0)
}
  0x28   : > { %s2119_s19 = smov 64   ;;  %s2120_s21 = smov 4  }
  0x29   : > { %1414 = dma.hbm_to_vmem [thread:$0]  (!%p1801_p11), %s2106_s1, 1024, %s1794_s15, [#allocation6], %s2119_s19, %s2119_s19, %s2120_s21  }
  0x2a   : > { %s1534_s10 = scalar_lea.hbm %s2108_s3, 1024 }
  0x2b   : > { %p1535_p1 = scmp.ne.s32.totalorder %s2108_s3, %s1534_s10  ;;  %p1541_p10 = scmp.lt.u32.totalorder %s1534_s10, %s2108_s3 }
  0x2d   : > { %p1537_p2 = pnand %p1535_p1, %p1817_p13 }
  0x2f   : > { %p1538_p6 = pneg %p1537_p2 }
  0x31   : > { %p1543_p3 = pnand %p1541_p10, %p1538_p6 }
  0x33   : > { %1546 = shalt.err (!%p1543_p3)
}
  0x34   : > { %s1547_s15 = scalar_lea.vmem %s1805_s18, 1024  ;;  %p1555_p12 = scmp.lt.s32.totalorder %s1805_s18, %s1805_s18 }
  0x35   : > { %p1548_p5 = scmp.ne.s32.totalorder %s1805_s18, %s1547_s15  ;;  %p1556_p0 = scmp.lt.s32.totalorder %s1547_s15, %s1547_s15 }
  0x37   : > { %p1550_p7 = pnand %p1548_p5, %p1817_p13  ;;  %p1557_p1 = por %p1556_p0, %p1555_p12 }
  0x39   : > { %p1551_p9 = pneg %p1550_p7 }
  0x3b   : > { %p1558_p2 = pnand %p1557_p1, %p1551_p9 }
  0x3d   : > { %1561 = shalt.err (!%p1558_p2)
}
  0x3e   : > { %1417 = dma.hbm_to_vmem [thread:$0]  (!%p1801_p11), %s2108_s3, 1024, %s1805_s18, [#allocation6], %s2119_s19, %s2119_s19, %s2120_s21  }
  0x3f   : > { %s1562_s24 = scalar_lea.hbm %s2110_s5, 1024 }
  0x40   : > { %p1563_p6 = scmp.ne.s32.totalorder %s2110_s5, %s1562_s24  ;;  %p1569_p5 = scmp.lt.u32.totalorder %s1562_s24, %s2110_s5 }
  0x42   : > { %p1565_p10 = pnand %p1563_p6, %p1817_p13 }
  0x44   : > { %p1566_p3 = pneg %p1565_p10 }
  0x46   : > { %p1571_p7 = pnand %p1569_p5, %p1566_p3 }
  0x48   : > { %1574 = shalt.err (!%p1571_p7)
}
  0x49   : > { %s1575_s15 = scalar_lea.vmem %s281_s20, 1024  ;;  %p1583_p1 = scmp.lt.s32.totalorder %s281_s20, %s281_s20 }
  0x4a   : > { %p1576_p9 = scmp.ne.s32.totalorder %s281_s20, %s1575_s15  ;;  %p1584_p2 = scmp.lt.s32.totalorder %s1575_s15, %s1575_s15 }
  0x4c   : > { %p1578_p12 = pnand %p1576_p9, %p1817_p13  ;;  %p1585_p4 = por %p1584_p2, %p1583_p1 }
  0x4e   : > { %p1579_p0 = pneg %p1578_p12 }
  0x50   : > { %p1586_p8 = pnand %p1585_p4, %p1579_p0 }
  0x52   : > { %1589 = shalt.err (!%p1586_p8)
}
  0x53   : > { %1420 = dma.hbm_to_vmem [thread:$0]  (!%p1801_p11), %s2110_s5, 1024, %s281_s20, [#allocation9], %s2119_s19, %s2119_s19, %s2120_s21  }
  0x54   : > { %s1890_s26 = sadd.s32 1, %s1694_s30   ;;  %s34_s12 = sadd.s32 1, %s1690_s29 }
  0x55   : > { %s31_s16 = ssub.s32 %s1694_s30, %s1890_s26  ;;  %p41_p8 = scmp.ne.s32.totalorder %s1690_s29, %s1686_s28 }
  0x56   : > { %p32_p4 = scmp.eq.s32.totalorder %s31_s16, 0  ;;  %p42_p13 = scmp.eq.s32.totalorder %s1694_s30, 0 }
  0x57   : > { %p1432_p6 = scmp.lt.s32.totalorder %s1694_s30, 2  ;;  %p2128_p3 = scmp.eq.s32.totalorder %s1771_s9, 1 }
  0x58   : > { %s1900_s22 = scalar_select %p32_p4, %s1690_s29, %s34_s12  }
  0x59   : > { %p43_p10 = por %p42_p13, %p41_p8  ;;  %p1904_p5 = por %p2128_p3, %p41_p8 }
  0x5a   : > { %s297_s24 = sand.u32 1, %s1690_s29   ;;  %s1202_s25 = smul.u32 768, %s1694_s30 }
  0x5b   : > { %s1393_s20 = smul.u32 48, %s297_s24  ;;  %p1910_p11 = pnand %p1432_p6, %p43_p10 }
  0x5c   : > { %s1917_s15 = scalar_lea.hbm %s2105_s0, %s1202_s25  ;;  %s1921_s16 = scalar_lea.sflag [#allocation3], %s297_s24 }
  0x5d   : > { %s301_s18 = scalar_lea.vmem [#allocation2], %s1393_s20  ;;  %s1590_s12 = scalar_lea.hbm %s1917_s15, 768 }
  0x5e   : > { %s308_s27 = sshll.u32 %s301_s18, 4  ;;  %p1591_p7 = scmp.ne.s32.totalorder %s1917_s15, %s1590_s12  ;;  %s1919_s27 = int_to_ptr.vmem [resolvable:$true] %s308_s27 }
  0x5f   : > { %p1592_p9 = pneg %p1910_p11  ;;  %s1595_s17 = scalar_lea.hbm %s2105_s0, 1536 }
  0x60   : > { %p1596_p1 = scmp.lt.u32.totalorder %s1917_s15, %s2105_s0  ;;  %p1597_p2 = scmp.lt.u32.totalorder %s1595_s17, %s1590_s12 }
  0x61   : > { %p1593_p12 = pnand %p1592_p9, %p1591_p7  ;;  %p1599_p8 = scmp.lt.u32.totalorder %s1590_s12, %s1917_s15 }
  0x62   : > { %p1598_p4 = por %p1597_p2, %p1596_p1 }
  0x63   : > { %p1594_p0 = pneg %p1593_p12 }
  0x64   : > { %p1600_p13 = por %p1599_p8, %p1598_p4 }
  0x66   : > { %p1601_p6 = pnand %p1600_p13, %p1594_p0 }
  0x68   : > { %1604 = shalt.err (!%p1601_p6)
}
  0x69   : > { %s1605_s24 = scalar_lea.vmem %s1919_s27, 768  ;;  %s1701_s20 = smov [#allocation2]  }
  0x6a   : > { %p1606_p10 = scmp.ne.s32.totalorder %s1919_s27, %s1605_s24  ;;  %s1610_s18 = sshll.u32 %s1701_s20, 4  ;;  %s1611_s18 = int_to_ptr.vmem [resolvable:$false] %s1610_s18 }
  0x6b   : > { %s1612_s19 = scalar_lea.vmem %s1611_s18, 1536  ;;  %p1613_p12 = scmp.lt.s32.totalorder %s1919_s27, %s1611_s18 }
  0x6c   : > { %p1608_p3 = pnand %p1606_p10, %p1592_p9  ;;  %p1614_p1 = scmp.lt.s32.totalorder %s1612_s19, %s1605_s24 }
  0x6e   : > { %p1609_p7 = pneg %p1608_p3  ;;  %p1615_p2 = por %p1614_p1, %p1613_p12 }
  0x70   : > { %p1616_p4 = pnand %p1615_p2, %p1609_p7 }
  0x72   : > { %1619 = shalt.err (!%p1616_p4)
}
  0x73   : > { %s2131_s21 = smov 4   ;;  %s2132_s12 = smov 64  }
  0x74   : > { %1424 = dma.hbm_to_vmem [thread:$0]  (!%p1910_p11), %s1917_s15, 768, %s1919_s27, %s1921_s16, %s2132_s12, %s2132_s12, %s2131_s21  }
  0x75   : > { %p2133_p9 = scmp.ne.s32.totalorder %s2125_s13, 0 }
  0x76   : > { %s1955_s25 = sand.u32 (!%p2133_p9), 1, %s1686_s28   ;;  %p2134_p0 = scmp.ne.s32.totalorder (!%p2133_p9), %s2122_s11, 0 }
  0x77   : > { %320 = sbr.rel (%p2133_p9) target bundleno = 845 (0x34d), region = 48  ;;  %s323_s17 = scalar_lea.sflag (!%p2133_p9), [#allocation3], %s1955_s25 }
  0x78   : > { %s1394_s14 = smul.u32 (!%p2133_p9), 48, %s1955_s25 }
  0x7a   : > { %s1961_s10 = scalar_lea.vmem (!%p2133_p9), [#allocation2], %s1394_s14 }
  0x7e   : > { %1665 = dma.done.wait (%p2134_p0), %s323_s17, 768  }
  0x7f   : > { %1667 = vsyncadd (%p2134_p0), %s323_s17, 4294966528  ;;  %p2135_p11 = scmp.eq.s32.totalorder %s1771_s9, 0 }
  0x81   : > { %1669 = dma.done.wait (%p2135_p11), [#allocation6], 2048   ;;  %p2136_p8 = pmov %p2135_p11 }
  0x83   : > { %1671 = vsyncadd (%p2136_p8), [#allocation6], 4294965248  ;;  %p2137_p13 = pmov %p2136_p8 }
  0x84   : > { %p2138_p6 = pmov %p2136_p8 }
  0x85   : > { %1673 = dma.done.wait (%p2137_p13), [#allocation9], 1024  }
  0x86   : > { %1675 = vsyncadd (%p2138_p6), [#allocation9], 4294966272  ;;  %v1476_v0 = vld [vmem:[#allocation5] sm:$0xff]   ;;  %v1477_v1 = vld [vmem:[#allocation5 + $0x8] sm:$0xff]   ;;  %s2002_s15 = scalar_lea.vmem [#allocation10], %s1394_s14  ;;  %s1215_s20 = smul.u32 768, %s1771_s9 }
  0x87   : > { %1293 = vmatprep.subr.bf16.mxu0 %v1476_v0  ;;  %v1478_v2 = vld [vmem:[#allocation5 + $0x10] sm:$0xff]   ;;  %v1479_v3 = vld [vmem:[#allocation5 + $0x18] sm:$0xff]   ;;  %v1480_v5 = vld [vmem:[#allocation5 + $0x20] sm:$0xff]   ;;  %s1015_s24 = sshll.u32 %s2002_s15, 4  ;;  %s998_s12 = scalar_lea.sflag [#allocation4], %s1955_s25  ;;  %s2023_s24 = int_to_ptr.vmem [resolvable:$true] %s1015_s24 }
  0x88   : > { %1294 = vmatpush3.bf16.msra.mxu0 %v1476_v0  ;;  %v1484_v4 = vld [vmem:[%s1961_s10] sm:$0xff]   ;;  %v1491_v7 = vld [vmem:[#allocation7 + $0x8] sm:$0xff]   ;;  %v1493_v11 = vld [vmem:[#allocation7 + $0x18] sm:$0xff]   ;;  %s2028_s21 = scalar_lea.hbm %s2113_s8, %s1215_s20  ;;  %s1620_s14 = scalar_lea.vmem %s2023_s24, 768 }
  0x89   : > { %1295 = vmatprep.subr.bf16.mxu0 %v1477_v1  ;;  %1309 = vmatprep.mubr.bf16.mxu0 %v1484_v4  ;;  %v1490_v6 = vld [vmem:[#allocation7] sm:$0xff]   ;;  %v1481_v8 = vld [vmem:[#allocation5 + $0x28] sm:$0xff]   ;;  %v1492_v9 = vld [vmem:[#allocation7 + $0x10] sm:$0xff]   ;;  %p1621_p10 = scmp.ne.s32.totalorder %s2023_s24, %s1620_s14  ;;  %s1702_s17 = smov [#allocation10]  }
  0x8a   : > { %1321 = vmatprep.subr.bf16.mxu1 %v1490_v6  ;;  %v1482_v10 = vld [vmem:[#allocation5 + $0x30] sm:$0xff]   ;;  %v1483_v12 = vld [vmem:[#allocation5 + $0x38] sm:$0xff]   ;;  %v1494_v13 = vld [vmem:[#allocation7 + $0x20] sm:$0xff]  }
  0x8b   : > { %1322 = vmatpush3.bf16.msra.mxu1 %v1490_v6  ;;  %v1485_v14 = vld [vmem:[%s1961_s10 + $0x8] sm:$0xff]   ;;  %v1486_v16 = vld [vmem:[%s1961_s10 + $0x10] sm:$0xff]   ;;  %v1487_v17 = vld [vmem:[%s1961_s10 + $0x18] sm:$0xff]   ;;  %p1622_p3 = pnand %p1621_p10, %p1904_p5 }
  0x8c   : > { %1296 = vmatpush3.bf16.msra.mxu0 %v1477_v1  ;;  %1323 = vmatprep.subr.bf16.mxu1 %v1491_v7  ;;  %v1495_v15 = vld [vmem:[#allocation7 + $0x28] sm:$0xff]   ;;  %v1488_v18 = vld [vmem:[%s1961_s10 + $0x20] sm:$0xff]   ;;  %v1497_v21 = vld [vmem:[#allocation7 + $0x38] sm:$0xff]  }
  0x8d   : > { %1297 = vmatprep.subr.bf16.mxu0 %v1478_v2  ;;  %v1489_v19 = vld [vmem:[%s1961_s10 + $0x28] sm:$0xff]   ;;  %v1496_v20 = vld [vmem:[#allocation7 + $0x30] sm:$0xff]   ;;  %v1498_v22 = vld [vmem:[#allocation8] sm:$0xff]   ;;  %p1623_p7 = pneg %p1622_p3  ;;  %s1624_s10 = sshll.u32 %s1702_s17, 4  ;;  %s1625_s10 = int_to_ptr.vmem [resolvable:$false] %s1624_s10 }
  0x8e   : > { %v1499_v23 = vld [vmem:[#allocation8 + $0x8] sm:$0xff]   ;;  %v1981_v24 = vld [vmem:[#allocation8 + $0x10] sm:$0xff]   ;;  %v1984_v25 = vld [vmem:[#allocation8 + $0x18] sm:$0xff]   ;;  %s1626_s11 = scalar_lea.vmem %s1625_s10, 1536  ;;  %p1627_p12 = scmp.lt.s32.totalorder %s2023_s24, %s1625_s10 }
  0x8f   : > { %1324 = vmatpush3.bf16.msra.mxu1 %v1491_v7  ;;  %v1988_v26 = vld [vmem:[#allocation8 + $0x20] sm:$0xff]   ;;  %v1992_v27 = vld [vmem:[#allocation8 + $0x28] sm:$0xff]   ;;  %v1504_v7 = vld [vmem:[#allocation8 + $0x30] sm:$0xff]   ;;  %p1628_p1 = scmp.lt.s32.totalorder %s1626_s11, %s1620_s14 }
  0x90   : > { %1298 = vmatpush3.bf16.msra.mxu0 %v1478_v2  ;;  %1325 = vmatprep.subr.bf16.mxu1 %v1492_v9  ;;  %v1154_v28 = vld [vmem:[%s2107_s2] ss:$0 sm:$0xff] }
  0x91   : > { %1299 = vmatprep.subr.bf16.mxu0 %v1479_v3  ;;  %p1629_p2 = por %p1628_p1, %p1627_p12 }
  0x93   : > { %1326 = vmatpush3.bf16.msra.mxu1 %v1492_v9  ;;  %v1181_v9 = vld [vmem:[%s2109_s4] ss:$0 sm:$0xff]  ;;  %p1630_p4 = pnand %p1629_p2, %p1623_p7 }
  0x94   : > { %1300 = vmatpush3.bf16.msra.mxu0 %v1479_v3  ;;  %1327 = vmatprep.subr.bf16.mxu1 %v1493_v11 }
  0x95   : > { %1301 = vmatprep.subr.bf16.mxu0 %v1480_v5 }
  0x97   : > { %1328 = vmatpush3.bf16.msra.mxu1 %v1493_v11 }
  0x98   : > { %1302 = vmatpush3.bf16.msra.mxu0 %v1480_v5  ;;  %1329 = vmatprep.subr.bf16.mxu1 %v1494_v13 }
  0x99   : > { %1303 = vmatprep.subr.bf16.mxu0 %v1481_v8 }
  0x9b   : > { %1330 = vmatpush3.bf16.msra.mxu1 %v1494_v13 }
  0x9c   : > { %1304 = vmatpush3.bf16.msra.mxu0 %v1481_v8  ;;  %1331 = vmatprep.subr.bf16.mxu1 %v1495_v15  ;;  %v1505_v8 = vld [vmem:[#allocation8 + $0x38] sm:$0xff]  }
  0x9d   : > { %1305 = vmatprep.subr.bf16.mxu0 %v1482_v10 }
  0x9f   : > { %1332 = vmatpush3.bf16.msra.mxu1 %v1495_v15 }
  0xa0   : > { %1306 = vmatpush3.bf16.msra.mxu0 %v1482_v10  ;;  %1333 = vmatprep.subr.bf16.mxu1 %v1496_v20 }
  0xa1   : > { %1307 = vmatprep.subr.bf16.mxu0 %v1483_v12 }
  0xa3   : > { %1334 = vmatpush3.bf16.msra.mxu1 %v1496_v20 }
  0xa4   : > { %1308 = vmatpush3.bf16.msra.mxu0 %v1483_v12  ;;  %1335 = vmatprep.subr.bf16.mxu1 %v1497_v21 }
  0xa5   : > { %1349 = vmatprep.subr.bf16.mxu0 %v1498_v22 }
  0xa7   : > { %1310 = vmatmul.mubr.bf16.vlgmr.msra.gmra.mrb[0].mxu0 %v1485_v14  ;;  %1336 = vmatpush3.bf16.msra.mxu1 %v1497_v21 }
  0xa8   : > { %1313 = vmatprep.mubr.bf16.mxu0 %v1486_v16  ;;  %1377 = vmatprep.subr.bf16.mxu1 %v1498_v22 }
  0xa9   : > { %1350 = vmatpush3.bf16.msra.mxu0 %v1498_v22 }
  0xaa   : > { %1351 = vmatprep.subr.bf16.mxu0 %v1499_v23 }
  0xad   : > { %1352 = vmatpush3.bf16.msra.mxu0 %v1499_v23 }
  0xae   : > { %1353 = vmatprep.subr.bf16.mxu0 %v1981_v24 }
  0xaf   : > { %1314 = vmatmul.mubr.bf16.gmra.mrb[4].mxu0 %v1487_v17 }
  0xb0   : > { %1317 = vmatprep.mubr.bf16.mxu0 %v1488_v18 }
  0xb1   : > { %1354 = vmatpush3.bf16.msra.mxu0 %v1981_v24 }
  0xb2   : > { %1355 = vmatprep.subr.bf16.mxu0 %v1984_v25 }
  0xb5   : > { %1356 = vmatpush3.bf16.msra.mxu0 %v1984_v25 }
  0xb6   : > { %1357 = vmatprep.subr.bf16.mxu0 %v1988_v26 }
  0xb7   : > { %1318 = vmatmul.mubr.bf16.gmra.mrb[8].mxu0 %v1489_v19 }
  0xb9   : > { %1358 = vmatpush3.bf16.msra.mxu0 %v1988_v26 }
  0xba   : > { %1359 = vmatprep.subr.bf16.mxu0 %v1992_v27 }
  0xbd   : > { %1360 = vmatpush3.bf16.msra.mxu0 %v1992_v27 }
  0xbe   : > { %1361 = vmatprep.subr.bf16.mxu0 %v1504_v7 }
  0xc1   : > { %1362 = vmatpush3.bf16.msra.mxu0 %v1504_v7 }
  0xc2   : > { %1363 = vmatprep.subr.bf16.mxu0 %v1505_v8 }
  0xc5   : > { %1364 = vmatpush3.bf16.msra.mxu0 %v1505_v8 }
 0x17a   : > { %v1311_v29 = vpop.f32.mrb[0].mxu0 }
 0x17b   : > { %v547_v30 = vadd.f32 %v1311_v29, %v1154_v28  ;;  %v538_v31 = vpop.f32.mrb[1].mxu0 }
 0x17c   : > { %v539_v32 = vadd.f32 %v1154_v28, %v538_v31  ;;  %v1312_v33 = vpop.f32.mrb[2].mxu0 }
 0x17d   : > { %v550_v34 = vadd.f32 %v1312_v33, %v1154_v28  ;;  %v541_v35 = vpop.f32.mrb[3].mxu0  ;;  %v587_v37 = vmax.f32 %v547_v30, 0.0 }
 0x17e   : > { %v542_v36 = vadd.f32 %v1154_v28, %v541_v35  ;;  %v585_v39 = vmax.f32 %v539_v32, 0.0 }
 0x17f   : > { %v588_v38 = vmax.f32 %v550_v34, 0.0 }
 0x180   : > { %v586_v40 = vmax.f32 %v542_v36, 0.0 }
 0x181   : > { %v598_v41 = vpack.c.bf16 %v588_v38, %v587_v37 }
 0x182   : > { %v1315_v42 = vpop.f32.mrb[4].mxu0  ;;  %v597_v43 = vpack.c.bf16 %v586_v40, %v585_v39 }
 0x183   : > { %1246 = vst [vmem:[%s2002_s15 + $0x8] sm:$0xff] %v598_v41   ;;  %v563_v44 = vadd.f32 %v1315_v42, %v1154_v28  ;;  %v554_v45 = vpop.f32.mrb[5].mxu0 }
 0x184   : > { %v555_v46 = vadd.f32 %v1154_v28, %v554_v45  ;;  %v1316_v47 = vpop.f32.mrb[6].mxu0  ;;  %1220 = vst [vmem:[%s2002_s15] sm:$0xff] %v597_v43   ;;  %1337 = vmatprep.mubr.bf16.mxu1 %v597_v43 }
 0x185   : > { %v566_v48 = vadd.f32 %v1316_v47, %v1154_v28  ;;  %v557_v49 = vpop.f32.mrb[7].mxu0  ;;  %1338 = vmatmul.mubr.bf16.vlgmr.msra.gmra.mrb[0].mxu1 %v598_v41  ;;  %v591_v51 = vmax.f32 %v563_v44, 0.0 }
 0x186   : > { %v558_v50 = vadd.f32 %v1154_v28, %v557_v49  ;;  %1385 = vmatpush3.bf16.msra.mxu1 %v1498_v22  ;;  %v589_v53 = vmax.f32 %v555_v46, 0.0 }
 0x187   : > { %v592_v52 = vmax.f32 %v566_v48, 0.0  ;;  %1378 = vmatprep.subr.bf16.mxu1 %v1499_v23 }
 0x188   : > { %v590_v54 = vmax.f32 %v558_v50, 0.0 }
 0x189   : > { %v600_v55 = vpack.c.bf16 %v592_v52, %v591_v51 }
 0x18a   : > { %v599_v56 = vpack.c.bf16 %v590_v54, %v589_v53  ;;  %v1319_v57 = vpop.f32.mrb[8].mxu0  ;;  %1386 = vmatpush3.bf16.msra.mxu1 %v1499_v23 }
 0x18b   : > { %1248 = vst [vmem:[%s2002_s15 + $0x18] sm:$0xff] %v600_v55   ;;  %v579_v58 = vadd.f32 %v1319_v57, %v1154_v28  ;;  %v570_v59 = vpop.f32.mrb[9].mxu0  ;;  %1379 = vmatprep.subr.bf16.mxu1 %v1981_v24 }
 0x18c   : > { %1247 = vst [vmem:[%s2002_s15 + $0x10] sm:$0xff] %v599_v56   ;;  %v571_v60 = vadd.f32 %v1154_v28, %v570_v59  ;;  %v1320_v61 = vpop.f32.mrb[10].mxu0  ;;  %1341 = vmatprep.mubr.bf16.mxu1 %v599_v56 }
 0x18d   : > { %v582_v62 = vadd.f32 %v1320_v61, %v1154_v28  ;;  %v573_v63 = vpop.f32.mrb[11].mxu0  ;;  %1342 = vmatmul.mubr.bf16.gmra.mrb[4].mxu1 %v600_v55  ;;  %v595_v1 = vmax.f32 %v579_v58, 0.0 }
 0x18e   : > { %v574_v0 = vadd.f32 %v1154_v28, %v573_v63  ;;  %1387 = vmatpush3.bf16.msra.mxu1 %v1981_v24  ;;  %v593_v3 = vmax.f32 %v571_v60, 0.0 }
 0x18f   : > { %v596_v2 = vmax.f32 %v582_v62, 0.0  ;;  %1380 = vmatprep.subr.bf16.mxu1 %v1984_v25 }
 0x190   : > { %v594_v4 = vmax.f32 %v574_v0, 0.0 }
 0x191   : > { %v602_v5 = vpack.c.bf16 %v596_v2, %v595_v1 }
 0x192   : > { %v601_v6 = vpack.c.bf16 %v594_v4, %v593_v3  ;;  %1388 = vmatpush3.bf16.msra.mxu1 %v1984_v25 }
 0x193   : > { %1250 = vst [vmem:[%s2002_s15 + $0x28] sm:$0xff] %v602_v5   ;;  %1381 = vmatprep.subr.bf16.mxu1 %v1988_v26 }
 0x194   : > { %1249 = vst [vmem:[%s2002_s15 + $0x20] sm:$0xff] %v601_v6   ;;  %1345 = vmatprep.mubr.bf16.mxu1 %v601_v6 }
 0x195   : > { %1346 = vmatmul.mubr.bf16.gmra.mrb[8].mxu1 %v602_v5 }
 0x196   : > { %1389 = vmatpush3.bf16.msra.mxu1 %v1988_v26 }
 0x197   : > { %1382 = vmatprep.subr.bf16.mxu1 %v1992_v27 }
 0x19a   : > { %1390 = vmatpush3.bf16.msra.mxu1 %v1992_v27 }
 0x19b   : > { %1383 = vmatprep.subr.bf16.mxu1 %v1504_v7 }
 0x19e   : > { %1391 = vmatpush3.bf16.msra.mxu1 %v1504_v7 }
 0x19f   : > { %1384 = vmatprep.subr.bf16.mxu1 %v1505_v8 }
 0x1a2   : > { %1392 = vmatpush3.bf16.msra.mxu1 %v1505_v8 }
 0x258   : > { %v1339_v10 = vpop.f32.mrb[0].mxu1 }
 0x259   : > { %v771_v11 = vadd.f32 %v1339_v10, %v1181_v9  ;;  %v762_v12 = vpop.f32.mrb[1].mxu1 }
 0x25a   : > { %v763_v13 = vadd.f32 %v1181_v9, %v762_v12  ;;  %v1340_v14 = vpop.f32.mrb[2].mxu1 }
 0x25b   : > { %v774_v15 = vadd.f32 %v1340_v14, %v1181_v9  ;;  %v765_v16 = vpop.f32.mrb[3].mxu1  ;;  %v811_v18 = vmax.f32 %v771_v11, 0.0 }
 0x25c   : > { %v766_v17 = vadd.f32 %v1181_v9, %v765_v16  ;;  %v809_v20 = vmax.f32 %v763_v13, 0.0 }
 0x25d   : > { %v812_v19 = vmax.f32 %v774_v15, 0.0 }
 0x25e   : > { %v810_v21 = vmax.f32 %v766_v17, 0.0 }
 0x25f   : > { %v822_v22 = vpack.c.bf16 %v812_v19, %v811_v18 }
 0x260   : > { %v821_v23 = vpack.c.bf16 %v810_v21, %v809_v20  ;;  %v1343_v24 = vpop.f32.mrb[4].mxu1 }
 0x261   : > { %v787_v25 = vadd.f32 %v1343_v24, %v1181_v9  ;;  %v778_v26 = vpop.f32.mrb[5].mxu1 }
 0x262   : > { %v779_v27 = vadd.f32 %v1181_v9, %v778_v26  ;;  %v1344_v28 = vpop.f32.mrb[6].mxu1  ;;  %1365 = vmatprep.mubr.bf16.mxu0 %v821_v23 }
 0x263   : > { %v790_v29 = vadd.f32 %v1344_v28, %v1181_v9  ;;  %v781_v30 = vpop.f32.mrb[7].mxu1  ;;  %1366 = vmatmul.mubr.bf16.vlgmr.msra.gmra.mrb[12].mxu0 %v822_v22  ;;  %v815_v32 = vmax.f32 %v787_v25, 0.0 }
 0x264   : > { %v782_v31 = vadd.f32 %v1181_v9, %v781_v30  ;;  %v813_v34 = vmax.f32 %v779_v27, 0.0 }
 0x265   : > { %v816_v33 = vmax.f32 %v790_v29, 0.0 }
 0x266   : > { %v814_v35 = vmax.f32 %v782_v31, 0.0 }
 0x267   : > { %v824_v36 = vpack.c.bf16 %v816_v33, %v815_v32 }
 0x268   : > { %v823_v37 = vpack.c.bf16 %v814_v35, %v813_v34  ;;  %v1347_v38 = vpop.f32.mrb[8].mxu1 }
 0x269   : > { %v803_v39 = vadd.f32 %v1347_v38, %v1181_v9  ;;  %v794_v40 = vpop.f32.mrb[9].mxu1 }
 0x26a   : > { %v795_v41 = vadd.f32 %v1181_v9, %v794_v40  ;;  %v1348_v42 = vpop.f32.mrb[10].mxu1  ;;  %1369 = vmatprep.mubr.bf16.mxu1 %v823_v37 }
 0x26b   : > { %v806_v43 = vadd.f32 %v1348_v42, %v1181_v9  ;;  %v797_v44 = vpop.f32.mrb[11].mxu1  ;;  %1370 = vmatmul.mubr.bf16.vlgmr.msra.gmra.mrb[12].mxu1 %v824_v36  ;;  %v819_v46 = vmax.f32 %v803_v39, 0.0 }
 0x26c   : > { %v798_v45 = vadd.f32 %v1181_v9, %v797_v44  ;;  %v817_v48 = vmax.f32 %v795_v41, 0.0 }
 0x26d   : > { %v820_v47 = vmax.f32 %v806_v43, 0.0 }
 0x26e   : > { %v818_v49 = vmax.f32 %v798_v45, 0.0 }
 0x26f   : > { %v826_v50 = vpack.c.bf16 %v820_v47, %v819_v46 }
 0x270   : > { %v825_v51 = vpack.c.bf16 %v818_v49, %v817_v48 }
 0x272   : > { %1373 = vmatprep.mubr.bf16.mxu1 %v825_v51 }
 0x273   : > { %1374 = vmatmul.mubr.bf16.gmra.mrb[16].mxu1 %v826_v50 }
 0x274   : > { %1633 = shalt.err (!%p1630_p4)
}
 0x275   : > { %s1634_s13 = scalar_lea.hbm %s2028_s21, 768  ;;  %s1638_s16 = scalar_lea.hbm %s2113_s8, 1536 }
 0x276   : > { %p1635_p9 = scmp.ne.s32.totalorder %s2028_s21, %s1634_s13  ;;  %p1639_p8 = scmp.lt.u32.totalorder %s2028_s21, %s2113_s8 }
 0x277   : > { %p1640_p13 = scmp.lt.u32.totalorder %s1638_s16, %s1634_s13  ;;  %p1642_p10 = scmp.lt.u32.totalorder %s1634_s13, %s2028_s21 }
 0x278   : > { %p1636_p0 = pnand %p1635_p9, %p1904_p5 }
 0x279   : > { %p1641_p6 = por %p1640_p13, %p1639_p8 }
 0x27a   : > { %p1637_p11 = pneg %p1636_p0 }
 0x27b   : > { %p1643_p3 = por %p1642_p10, %p1641_p6 }
 0x27d   : > { %p1644_p7 = pnand %p1643_p3, %p1637_p11 }
 0x27f   : > { %1647 = shalt.err (!%p1644_p7)
}
 0x280   : > { %s1703_s19 = smov 64   ;;  %s1704_s14 = smov 4   ;;  %v1190_v52 = vld [vmem:[%s2111_s6] ss:$0 sm:$0xff]  ;;  %vm979_vm0 = vcmask 15360  }
 0x281   : > { %1409 = dma.vmem_to_hbm [thread:$0]  (%p1904_p5), %s2023_s24, 768, %s2028_s21, %s998_s12, %s1703_s19, %s1703_s19, %s1704_s14  }
 0x282   : > { %s377_s17 = smul.u32 12, %s1771_s9 }
 0x284   : > { %p378_p12 = scmp.lt.s32.totalorder %s377_s17, 23 }
 0x286   : > { %s2148_s17 = smov (!%p378_p12, %s377_s17), 23 }
 0x287   : > { %s1153_s10 = sshll.u32 %s2148_s17, 3 }
 0x288   : > { %s2061_s16 = scalar_lea.vmem %s2112_s7, %s1153_s10 }
 0x336   : > { %v1367_v53 = vpop.f32.mrb[12].mxu0 }
 0x337   : > { %v941_v54 = vadd.f32 %v1367_v53, %v1190_v52  ;;  %v932_v55 = vpop.f32.mrb[13].mxu0 }
 0x338   : > { %v933_v56 = vadd.f32 %v1190_v52, %v932_v55  ;;  %v1368_v57 = vpop.f32.mrb[14].mxu0 }
 0x339   : > { %982 = vst.msk [vmem:[%s2061_s16 + $0x10] sm:$0xff] %vm979_vm0, %v941_v54  ;;  %v944_v58 = vadd.f32 %v1368_v57, %v1190_v52  ;;  %v935_v59 = vpop.f32.mrb[15].mxu0 }
 0x33a   : > { %980 = vst.msk [vmem:[%s2061_s16] sm:$0xff] %vm979_vm0, %v933_v56  ;;  %v936_v60 = vadd.f32 %v1190_v52, %v935_v59 }
 0x33b   : > { %983 = vst.msk [vmem:[%s2061_s16 + $0x18] sm:$0xff] %vm979_vm0, %v944_v58 }
 0x33c   : > { %981 = vst.msk [vmem:[%s2061_s16 + $0x8] sm:$0xff] %vm979_vm0, %v936_v60 }
 0x33e   : > { %v1371_v61 = vpop.f32.mrb[12].mxu1 }
 0x33f   : > { %v957_v62 = vadd.f32 %v1371_v61, %v1190_v52  ;;  %v948_v63 = vpop.f32.mrb[13].mxu1 }
 0x340   : > { %v949_v0 = vadd.f32 %v1190_v52, %v948_v63  ;;  %v1372_v1 = vpop.f32.mrb[14].mxu1 }
 0x341   : > { %986 = vst.msk [vmem:[%s2061_s16 + $0x30] sm:$0xff] %vm979_vm0, %v957_v62  ;;  %v960_v2 = vadd.f32 %v1372_v1, %v1190_v52  ;;  %v951_v3 = vpop.f32.mrb[15].mxu1 }
 0x342   : > { %984 = vst.msk [vmem:[%s2061_s16 + $0x20] sm:$0xff] %vm979_vm0, %v949_v0  ;;  %v952_v4 = vadd.f32 %v1190_v52, %v951_v3 }
 0x343   : > { %987 = vst.msk [vmem:[%s2061_s16 + $0x38] sm:$0xff] %vm979_vm0, %v960_v2 }
 0x344   : > { %985 = vst.msk [vmem:[%s2061_s16 + $0x28] sm:$0xff] %vm979_vm0, %v952_v4 }
 0x346   : > { %v1375_v5 = vpop.f32.mrb[16].mxu1 }
 0x347   : > { %v973_v6 = vadd.f32 %v1375_v5, %v1190_v52  ;;  %v964_v7 = vpop.f32.mrb[17].mxu1 }
 0x348   : > { %v965_v8 = vadd.f32 %v1190_v52, %v964_v7  ;;  %v1376_v9 = vpop.f32.mrb[18].mxu1 }
 0x349   : > { %990 = vst.msk [vmem:[%s2061_s16 + $0x50] sm:$0xff] %vm979_vm0, %v973_v6  ;;  %v976_v10 = vadd.f32 %v1376_v9, %v1190_v52  ;;  %v967_v11 = vpop.f32.mrb[19].mxu1 }
 0x34a   : > { %988 = vst.msk [vmem:[%s2061_s16 + $0x40] sm:$0xff] %vm979_vm0, %v965_v8  ;;  %v968_v12 = vadd.f32 %v1190_v52, %v967_v11 }
 0x34b   : > { %991 = vst.msk [vmem:[%s2061_s16 + $0x58] sm:$0xff] %vm979_vm0, %v976_v10 }
 0x34c   : > { %989 = vst.msk [vmem:[%s2061_s16 + $0x48] sm:$0xff] %vm979_vm0, %v968_v12 }
 0x34d PF: > { %s2139_s9 = sld [smem:[#allocation15_spill]]  ;;  %s2140_s23 = sld [smem:[#allocation16_spill]] }
 0x34e   : > { %p2142_p1 = scmp.ge.s32.totalorder %s1694_s30, 2 }
 0x353   : > { %s1038_s25 = sand.u32 1, %s2139_s9   ;;  %p2141_p5 = scmp.ne.s32.totalorder %s2140_s23, 0 }
 0x354   : > { %s1039_s24 = scalar_lea.sflag [#allocation4], %s1038_s25 }
 0x355   : > { %p1426_p2 = pnand %p2142_p1, %p2141_p5 }
 0x357   : > { %1677 = dma.done.wait (!%p1426_p2), %s1039_s24, 768  }
 0x358   : > { %1679 = vsyncadd (!%p1426_p2), %s1039_s24, 4294966528  ;;  %p24_p4 = scmp.ge.s32.totalorder %s1890_s26, 4   ;;  %s2143_s27 = smov %s1686_s28 }
 0x359   : > { %s2144_s28 = smov %s1690_s29  ;;  %s2145_s29 = smov %s1900_s22 }
 0x35a   : > { %s2146_s30 = smov %s1890_s26  ;;  %26 = sbr.rel (!%p24_p4) target bundleno = 7 (0x7), region = 117 }
 0x361   :  { %1044 = vsyncpa [#allocation3], 1 }
 0x362   :  { %1046 = vsyncpa [#allocation3 + $0x1], 1 }
 0x363   :  { %1047 = vsyncpa [#allocation6], 1 }
 0x364   :  { %1048 = vsyncpa [#allocation9], 1 }
 0x365   :  { %1049 = vsyncpa [#allocation4], 1 }
 0x366   :  { %1051 = vsyncpa [#allocation4 + $0x1], 1 }

</bundles_post_ra>
